<compile_context>
chip_gen: v5e
topology: v5e:2x2
jax: 0.10.0
libtpu: 0.0.40
codegen_flags: <defaults>
</compile_context>

<pallas_src>
import functools

import jax
import jax.numpy as jnp
from jax.experimental import pallas as pl
from jax.experimental.pallas import tpu as pltpu


# ---------------------------------------------------------------------------
# Tiling helpers
# ---------------------------------------------------------------------------
def _pick_tile(n, candidates=(512, 384, 256, 128)):
    """Largest lane-friendly tile that divides n, else the full extent."""
    for c in candidates:
        if n % c == 0:
            return c
    return n


def _fused_vmem_bytes(C, N, tq):
    f32 = 4
    bufs = C * tq + C * N + C * tq + C * tq                 # yq, yk, res, out
    weights = C * C + C + 2 * (2 * C) * C + 2 * C + C * (2 * C) + C
    interm = 3 * tq * N + 3 * C * tq + 2 * C * tq           # dist/onehot, agg/h, g
    return f32 * (2 * (bufs + weights) + interm)


def _vmem_limit(est_bytes):
    # Keep the compiler default (16/32 MiB) for small tiles; raise it only when the
    # tile footprint clearly needs it, capped below v7x's 64 MiB physical VMEM.
    if est_bytes <= 12 * 2**20:
        return None
    return int(min(max(2 * est_bytes, 32 * 2**20), 56 * 2**20))


# ---------------------------------------------------------------------------
# Kernel 1: fc1 — 1x1 conv (+ folded BN) in channels-first orientation.
#   out(Cout, TN) = W(Cout, Cin) @ x(Cin, TN) + b
# ---------------------------------------------------------------------------
def _pointwise_conv_kernel(x_ref, w_ref, b_ref, o_ref):
    y = jnp.dot(w_ref[...], x_ref[...], preferred_element_type=jnp.float32)
    o_ref[...] = (y + b_ref[...]).astype(o_ref.dtype)


def pointwise_conv_cf(x, w, b, tn):
    """x: (B, Cin, N), w: (Cout, Cin), b: (Cout, 1) -> (B, Cout, N)."""
    B, Cin, N = x.shape
    Cout = w.shape[0]
    cost = pl.CostEstimate(
        flops=2 * B * N * Cin * Cout,
        transcendentals=0,
        bytes_accessed=4 * (B * Cin * N + Cin * Cout + Cout + B * Cout * N),
    )
    return pl.pallas_call(
        _pointwise_conv_kernel,
        out_shape=jax.ShapeDtypeStruct((B, Cout, N), x.dtype),
        grid=(B, N // tn),
        in_specs=[
            pl.BlockSpec((None, Cin, tn), lambda bi, ti: (bi, 0, ti)),
            pl.BlockSpec((Cout, Cin), lambda bi, ti: (0, 0)),
            pl.BlockSpec((Cout, 1), lambda bi, ti: (0, 0)),
        ],
        out_specs=pl.BlockSpec((None, Cout, tn), lambda bi, ti: (bi, 0, ti)),
        compiler_params=pltpu.CompilerParams(
            dimension_semantics=("parallel", "parallel")),
        cost_estimate=cost,
    )(x, w, b)


# ---------------------------------------------------------------------------
# Kernel 2 (fused): dense KNN graph + neighbor max-agg + GraphSAGE(nn1, split-nn2,
#                   sigmoid) + fc2 (folded BN) + residual.
# Per grid step: one batch, one query-node tile (C on sublanes, nodes on lanes).
# ---------------------------------------------------------------------------
def _graph_sage_fused_kernel(yq_ref, yk_ref, res_ref,
                             nn1_w_ref, nn1_b_ref,
                             nn2_wh_ref, nn2_wj_ref, nn2_b_ref,
                             fc2_w_ref, fc2_b_ref,
                             o_ref, *, k):
    yq = yq_ref[...].astype(jnp.float32)            # (C, TQ)  fc1 output, query tile
    yk = yk_ref[...].astype(jnp.float32)            # (C, N)   fc1 output, all nodes
    c, tq = yq.shape
    n = yk.shape[1]

    # ---- DenseDilatedKnnGraph (d=1): L2-normalize over channels, rank by inner ----
    # rsqrt goes to the EUP slot; unit-norm => dist = 2 - 2*inner, so ranking by
    # -inner is identical to ranking by the full pairwise distance.
    inv_q = jax.lax.rsqrt(jnp.maximum(jnp.sum(yq * yq, axis=0, keepdims=True), 1e-24))
    inv_k = jax.lax.rsqrt(jnp.maximum(jnp.sum(yk * yk, axis=0, keepdims=True), 1e-24))
    xnq = yq * inv_q
    xnk = yk * inv_k
    d = -jax.lax.dot_general(xnq, xnk, (((0,), (0,)), ((), ())),
                             preferred_element_type=jnp.float32)       # (TQ, N)

    col = jax.lax.broadcasted_iota(jnp.int32, (tq, n), 1)
    agg = jnp.full((c, tq), -jnp.inf, dtype=jnp.float32)
    # k iterations of (row argmin -> one-hot gather on the MXU -> running max).
    # Ties broken by smallest column index (torch.topk tie order is unspecified).
    for _ in range(k):
        row_min = jnp.min(d, axis=-1, keepdims=True)                   # (TQ, 1)
        sel = jnp.min(jnp.where(d <= row_min, col, n), axis=-1, keepdims=True)
        onehot = col == sel                                            # (TQ, N) bool
        picked = jax.lax.dot_general(
            yk, onehot.astype(jnp.float32), (((1,), (1,)), ((), ())),
            preferred_element_type=jnp.float32)                        # (C, TQ)
        agg = jnp.maximum(agg, picked)
        d = jnp.where(onehot, jnp.inf, d)                              # reuse onehot

    # ---- GraphSAGE: nn1 on center features, split-weight nn2 on [h ; x_j] --------
    h = jnp.dot(nn1_w_ref[...], yq, preferred_element_type=jnp.float32)
    h = jnp.maximum(h + nn1_b_ref[...], 0.0)                           # (C, TQ)
    g = (jnp.dot(nn2_wh_ref[...], h, preferred_element_type=jnp.float32)
         + jnp.dot(nn2_wj_ref[...], agg, preferred_element_type=jnp.float32)
         + nn2_b_ref[...])                                             # (2C, TQ)
    g = jax.nn.sigmoid(jnp.maximum(g, 0.0))                            # ReLU then sigmoid

    # ---- fc2 (1x1 conv + folded BN) + residual with the Grapher input ------------
    out = jnp.dot(fc2_w_ref[...], g, preferred_element_type=jnp.float32)
    o_ref[...] = (out + fc2_b_ref[...] + res_ref[...]).astype(o_ref.dtype)


def graph_conv_fc2_residual(y, x_res, params, k, tq):
    """y: fc1 output (B, C, N); x_res: Grapher input (B, C, N)."""
    B, C, N = y.shape
    C2 = 2 * C
    est = _fused_vmem_bytes(C, N, tq)
    cost = pl.CostEstimate(
        flops=B * (2 * C * N * N * (1 + k)
                   + 2 * C * C * N + 2 * C2 * C * N * 2 + 2 * C * C2 * N),
        transcendentals=B * N * (C2 + 2),
        bytes_accessed=4 * (B * (4 * C * N) + C * C + C2 * C * 2 + C * C2 + 4 * C2),
    )
    return pl.pallas_call(
        functools.partial(_graph_sage_fused_kernel, k=k),
        out_shape=jax.ShapeDtypeStruct((B, C, N), y.dtype),
        grid=(B, N // tq),
        in_specs=[
            pl.BlockSpec((None, C, tq), lambda bi, ti: (bi, 0, ti)),   # y (query tile)
            pl.BlockSpec((None, C, N), lambda bi, ti: (bi, 0, 0)),     # y (all keys)
            pl.BlockSpec((None, C, tq), lambda bi, ti: (bi, 0, ti)),   # residual tile
            pl.BlockSpec((C, C), lambda bi, ti: (0, 0)),               # nn1_w
            pl.BlockSpec((C, 1), lambda bi, ti: (0, 0)),               # nn1_b
            pl.BlockSpec((C2, C), lambda bi, ti: (0, 0)),              # nn2_w[:, :C]
            pl.BlockSpec((C2, C), lambda bi, ti: (0, 0)),              # nn2_w[:, C:]
            pl.BlockSpec((C2, 1), lambda bi, ti: (0, 0)),              # nn2_b
            pl.BlockSpec((C, C2), lambda bi, ti: (0, 0)),              # fc2_w
            pl.BlockSpec((C, 1), lambda bi, ti: (0, 0)),               # fc2_b
        ],
        out_specs=pl.BlockSpec((None, C, tq), lambda bi, ti: (bi, 0, ti)),
        compiler_params=pltpu.CompilerParams(
            dimension_semantics=("parallel", "parallel"),
            vmem_limit_bytes=_vmem_limit(est)),
        cost_estimate=cost,
    )(y, y, x_res,
      params["nn1_w"], params["nn1_b"],
      params["nn2_wh"], params["nn2_wj"], params["nn2_b"],
      params["fc2_w"], params["fc2_b"])


# ---------------------------------------------------------------------------
# Parameter construction (deterministic, synthetic) + BN folding
# ---------------------------------------------------------------------------
def _fold_conv_bn(w, b, gamma, beta, mean, var, eps=1e-5):
    """Fold eval-mode BatchNorm into a 1x1 conv.  w: (Cout, Cin) torch layout.
    Returns channels-first weight (Cout, Cin) and bias (Cout, 1)."""
    scale = gamma / jnp.sqrt(var + eps)
    w_eff = w * scale[:, None]
    b_eff = (b - mean) * scale + beta
    return w_eff.astype(jnp.float32), b_eff[:, None].astype(jnp.float32)


def init_params(key, C):
    ks = jax.random.split(key, 10)
    f = jnp.float32

    def conv_w(k_, cout, cin):
        return jax.random.normal(k_, (cout, cin), f) * (1.0 / jnp.sqrt(cin))

    def bn(k_, c):
        k1, k2, k3, k4 = jax.random.split(k_, 4)
        gamma = jax.random.uniform(k1, (c,), f, 0.5, 1.5)
        beta = jax.random.normal(k2, (c,), f) * 0.1
        mean = jax.random.normal(k3, (c,), f) * 0.1
        var = jax.random.uniform(k4, (c,), f, 0.5, 1.5)
        return gamma, beta, mean, var

    # fc1: Conv2d(C, C, 1) + BN(C)
    fc1_w, fc1_b = _fold_conv_bn(conv_w(ks[0], C, C),
                                 jax.random.normal(ks[1], (C,), f) * 0.05,
                                 *bn(ks[2], C))
    # GraphSAGE nn1: Conv2d(C, C, 1) + ReLU
    nn1_w = conv_w(ks[3], C, C)
    nn1_b = (jax.random.normal(ks[4], (C,), f) * 0.05)[:, None]
    # GraphSAGE nn2: Conv2d(2C, 2C, 1) + ReLU (then sigmoid); split over cat = [h ; x_j]
    nn2_w = conv_w(ks[5], 2 * C, 2 * C)
    nn2_b = (jax.random.normal(ks[6], (2 * C,), f) * 0.05)[:, None]
    # fc2: Conv2d(2C, C, 1) + BN(C)
    fc2_w, fc2_b = _fold_conv_bn(conv_w(ks[7], C, 2 * C),
                                 jax.random.normal(ks[8], (C,), f) * 0.05,
                                 *bn(ks[9], C))
    return dict(fc1_w=fc1_w, fc1_b=fc1_b,
                nn1_w=nn1_w, nn1_b=nn1_b,
                nn2_wh=nn2_w[:, :C], nn2_wj=nn2_w[:, C:], nn2_b=nn2_b,
                fc2_w=fc2_w, fc2_b=fc2_b)


# ---------------------------------------------------------------------------
# Grapher forward (channels-first node layout; no wrapper transposes)
# ---------------------------------------------------------------------------
def grapher_forward(x_nchw, params, k=9):
    B, C, H, W = x_nchw.shape
    N = H * W
    x = x_nchw.reshape(B, C, N)                    # (B, C, N), contiguous reshape only
    tn = _pick_tile(N)

    # fc1 (1x1 conv + folded BN)
    y = pointwise_conv_cf(x, params["fc1_w"], params["fc1_b"], tn)

    # DyGraphConv2d('sage') + fc2 + residual, fully fused
    out = graph_conv_fc2_residual(y, x, params, k, tn)

    return out.reshape(B, C, H, W)


if __name__ == "__main__":
    key = jax.random.PRNGKey(0)
    k_x, k_p = jax.random.split(key)

    B, C, H, W = 2, 32, 8, 8          # N = 64 nodes, kernel_size k = 9 neighbors
    x = jax.random.normal(k_x, (B, C, H, W), jnp.float32)
    params = init_params(k_p, C)

    out = grapher_forward(x, params, k=9)
    out = jax.block_until_ready(out)
    assert out.shape == (B, C, H, W) and out.dtype == jnp.float32
    assert bool(jnp.all(jnp.isfinite(out)))
    print("KERNEL_OK")
</pallas_src>

<mosaic_0001>
module attributes {stable_mosaic.version = 11 : i64} {
  func.func @_pointwise_conv_kernel(%arg0: i32, %arg1: i32, %arg2: memref<1x32x64xf32, #tpu.memory_space<vmem>>, %arg3: memref<32x32xf32, #tpu.memory_space<vmem>>, %arg4: memref<32x1xf32, #tpu.memory_space<vmem>>, %arg5: memref<1x32x64xf32, #tpu.memory_space<vmem>>) attributes {dimension_semantics = [#tpu.dimension_semantics<parallel>, #tpu.dimension_semantics<parallel>], iteration_bounds = array<i64: 2, 1>, scalar_prefetch = 0 : i64, scratch_operands = 0 : i64, tpu.core_type = #tpu.core_type<tc>, window_params = [{transform_indices = @transform_0, window_bounds = array<i64: 1, 32, 64>}, {pipeline_mode = #tpu.pipeline_mode<synchronous>, transform_indices = @transform_1, window_bounds = array<i64: 32, 32>}, {pipeline_mode = #tpu.pipeline_mode<synchronous>, transform_indices = @transform_2, window_bounds = array<i64: 32, 1>}, {transform_indices = @transform_3, window_bounds = array<i64: 1, 32, 64>}]} {
    %c0 = arith.constant 0 : index
    %c0_0 = arith.constant 0 : index
    %0 = vector.load %arg3[%c0, %c0_0] : memref<32x32xf32, #tpu.memory_space<vmem>>, vector<32x32xf32>
    %c0_1 = arith.constant 0 : index
    %c0_2 = arith.constant 0 : index
    %c0_3 = arith.constant 0 : index
    %1 = vector.load %arg2[%c0_1, %c0_2, %c0_3] : memref<1x32x64xf32, #tpu.memory_space<vmem>>, vector<1x32x64xf32>
    %2 = vector.shape_cast %1 : vector<1x32x64xf32> to vector<32x64xf32>
    %cst = arith.constant dense<0.000000e+00> : vector<32x64xf32>
    %3 = tpu.matmul %0, %2, %cst {dimension_numbers = #tpu.dot_dimension_numbers<[1], [0], [0], [1], [0, 0, 1, 1], [], []>} : vector<32x32xf32>, vector<32x64xf32>, vector<32x64xf32> -> vector<32x64xf32>
    %c0_4 = arith.constant 0 : index
    %c0_5 = arith.constant 0 : index
    %4 = vector.load %arg4[%c0_4, %c0_5] : memref<32x1xf32, #tpu.memory_space<vmem>>, vector<32x1xf32>
    %5 = vector.broadcast %4 : vector<32x1xf32> to vector<32x64xf32>
    %6 = arith.addf %3, %5 : vector<32x64xf32>
    %c0_6 = arith.constant 0 : index
    %c0_7 = arith.constant 0 : index
    %c0_8 = arith.constant 0 : index
    %7 = vector.load %arg5[%c0_6, %c0_7, %c0_8] : memref<1x32x64xf32, #tpu.memory_space<vmem>>, vector<1x32x64xf32>
    %8 = vector.shape_cast %7 : vector<1x32x64xf32> to vector<32x64xf32>
    %9 = vector.shape_cast %6 : vector<32x64xf32> to vector<1x32x64xf32>
    tpu.vector_store %arg5[%c0_6, %c0_7, %c0_8], %9 {strides = array<i32>} : memref<1x32x64xf32, #tpu.memory_space<vmem>>, vector<1x32x64xf32>,
    return
  }
  func.func @transform_0(%arg0: i32, %arg1: i32) -> (i32, i32, i32) {
    %c0_i32 = arith.constant 0 : i32
    %c0_i32_0 = arith.constant 0 : i32
    return %arg0, %c0_i32, %arg1 : i32, i32, i32
  }
  func.func @transform_1(%arg0: i32, %arg1: i32) -> (i32, i32) {
    %c0_i32 = arith.constant 0 : i32
    %c0_i32_0 = arith.constant 0 : i32
    %c0_i32_1 = arith.constant 0 : i32
    return %c0_i32, %c0_i32_0 : i32, i32
  }
  func.func @transform_2(%arg0: i32, %arg1: i32) -> (i32, i32) {
    %c0_i32 = arith.constant 0 : i32
    %c0_i32_0 = arith.constant 0 : i32
    %c0_i32_1 = arith.constant 0 : i32
    return %c0_i32, %c0_i32_0 : i32, i32
  }
  func.func @transform_3(%arg0: i32, %arg1: i32) -> (i32, i32, i32) {
    %c0_i32 = arith.constant 0 : i32
    %c0_i32_0 = arith.constant 0 : i32
    return %arg0, %c0_i32, %arg1 : i32, i32, i32
  }
}

</mosaic_0001>

<bundles_post_ra>
// kernel: tpu_custom_call.1
= control target key start
LH: loop header
LB: loop body
LE: loop exit
PB: predicated region body
PF: predicated region fallthrough
CT: control target
= control target key end

     0   :  { %8 = vsyncpa [#allocation3], 0  ;;  %s782_s0 = inlined_call_operand.hbm [shape: f32[2,32,64], index: 0, kind: input, shape index: {}]   ;;  %s783_s1 = inlined_call_operand.vmem [shape: f32[32,32], index: 1, kind: input, shape index: {}]   ;;  %s784_s2 = inlined_call_operand.vmem [shape: f32[32,1], index: 2, kind: input, shape index: {}]   ;;  %s785_s3 = inlined_call_operand.hbm [shape: f32[2,32,64], index: 3, kind: output, shape index: {}]  }
   0x1   :  { %10 = vsyncpa [#allocation3 + $0x1], 0 }
   0x2   :  { %11 = vsyncpa [#allocation4], 0 }
   0x3   :  { %13 = vsyncpa [#allocation4 + $0x1], 0  ;;  %s630_s12 = smov 0   ;;  %s632_s13 = smov 0  }
   0x4   :  { %s634_s14 = smov 0   ;;  %s636_s15 = smov 0  }
   0x5   :  { %s638_s16 = smov 0   ;;  %s640_s17 = smov 0  }
   0x6 LB: > { %s389_s18 = sadd.s32 4294967295, %s603_s17   ;;  %s390_s19 = sadd.s32 4294967294, %s603_s17   ;;  %s603_s17 = sphi %s640_s17, %s19_s17   ;;  %s599_s16 = sphi %s638_s16, %s794_s16   ;;  %s595_s15 = sphi %s636_s15, %s793_s15   ;;  %s591_s14 = sphi %s634_s14, %s792_s14   ;;  %s587_s13 = sphi %s632_s13, %s791_s13   ;;  %s583_s12 = sphi %s630_s12, %s790_s12  }
   0x7   : > { %s31_s20 = sadd.s32 1, %s599_s16  ;;  %s40_s21 = sadd.s32 1, %s591_s14 }
   0x8   : > { %p33_p0 = scmp.ge.s32.totalorder %s31_s20, 2  ;;  %p47_p1 = scmp.ne.s32.totalorder %s591_s14, %s587_s13 }
   0x9   : > { %p48_p2 = scmp.eq.s32.totalorder %s603_s17, 0  ;;  %p53_p3 = scmp.ne.s32.totalorder %s587_s13, %s583_s12 }
   0xa   : > { %s796_s20 = smov (%p33_p0, %s31_s20), 0  ;;  %p54_p5 = scmp.eq.s32.totalorder %s389_s18, 0 }
   0xb   : > { %p671_p4 = por %p48_p2, %p47_p1  ;;  %s35_s23 = ssub.s32 %s599_s16, %s796_s20 }
   0xc   : > { %p121_p6 = scmp.eq.s32.totalorder %s389_s18, 1  ;;  %p38_p7 = scmp.eq.s32.totalorder %s35_s23, 0 }
   0xd   : > { %p677_p8 = por %p54_p5, %p53_p3  ;;  %p127_p10 = scmp.eq.s32.totalorder %s390_s19, 1 }
   0xe   : > { %p681_p9 = por %p121_p6, %p47_p1  ;;  %p392_p12 = scmp.ge.s32.totalorder %s603_s17, 2 }
   0xf   : > { %s686_s26 = scalar_select %p38_p7, %s591_s14, %s40_s21  }
  0x10   : > { %p688_p11 = por %p127_p10, %p53_p3  ;;  %p434_p13 = scmp.lt.s32.totalorder %s603_s17, 2 }
  0x11   : > { %s153_s28 = sand.u32 1, %s591_s14   ;;  %s408_s30 = sshll.u32 %s599_s16, 5 }
  0x12   : > { %s393_s29 = sshll.u32 %s153_s28, 5  ;;  %s163_s6 = scalar_lea.hbm %s782_s0, %s408_s30 }
  0x13   : > { %s157_s7 = scalar_lea.vmem [#allocation2], %s393_s29  ;;  %s164_s9 = sshll.u32 %s163_s6, 4  ;;  %s165_s9 = int_to_ptr.hbm [resolvable:$true] %s164_s9 }
  0x14   : > { %s166_s8 = sshll.u32 %s157_s7, 4  ;;  %p427_p0 = pnand %p434_p13, %p671_p4  ;;  %s167_s8 = int_to_ptr.vmem [resolvable:$true] %s166_s8 }
  0x15   : > { %p396_p1 = scmp.ge.s32.totalorder %s603_s17, 1  ;;  %s154_s10 = scalar_lea.sflag [#allocation3], %s153_s28 }
  0x16   : > { %s605_s11 = smov 128   ;;  %s606_s18 = smov 8  }
  0x17   : > { %429 = dma.hbm_to_vmem [thread:$0]  (!%p427_p0), %s165_s9, 512, %s167_s8, %s154_s10, %s605_s11, %s605_s11, %s606_s18  }
  0x18   : > { %p174_p2 = scmp.lt.s32.totalorder %s603_s17, 3 }
  0x1a   : > { %p175_p3 = pnand %p396_p1, %p174_p2 }
  0x1b   : > { %s704_s19 = sand.u32 (!%p175_p3), 1, %s587_s13  }
  0x1c   : > { %178 = sbr.rel (%p175_p3) target bundleno = 184 (0xb8), region = 32  ;;  %s397_s21 = sshll.u32 (!%p175_p3), %s704_s19, 5 }
  0x1d   : > { %s181_s23 = scalar_lea.sflag (!%p175_p3), [#allocation3], %s704_s19  ;;  %s184_s22 = scalar_lea.vmem (!%p175_p3), [#allocation2], %s397_s21 }
  0x21   : > { %574 = dma.done.wait (%p677_p8), %s181_s23, 512  }
  0x22   : > { %576 = vsyncadd (%p677_p8), %s181_s23, 4294966784  ;;  %v607_v0 = vmov 0   ;;  %v215_v1 = vld [vmem:[%s184_s22 + $0x18] sm:$0xff]  ;;  %v214_v2 = vld [vmem:[%s184_s22 + $0x10] sm:$0xff]  ;;  %vm240_vm0 = vcmask 261120   ;;  %s409_s28 = sshll.u32 %s595_s15, 5 }
  0x23   : > { %490 = vset.pattern.permute.xlu1 %v607_v0  ;;  %489 = vset.pattern.permute.xlu0 %v607_v0  ;;  %v213_v3 = vld [vmem:[%s184_s22 + $0x8] sm:$0xff]  ;;  %v212_v4 = vld [vmem:[%s184_s22] sm:$0xff]  ;;  %v210_v7 = vld [vmem:[%s783_s1 + $0x10] sm:$0xff]  ;;  %vm282_vm1 = vcmask 523264   ;;  %s300_s4 = scalar_lea.hbm %s785_s3, %s409_s28  ;;  %s207_s5 = scalar_lea.vmem [#allocation5], %s397_s21 }
  0x24   : > { %265 = vmatpush.msra.mxu0 %v215_v1  ;;  %410 = vmatpush.msra.mxu1 %v215_v1  ;;  %v208_v5 = vld [vmem:[%s783_s1] sm:$0xff]  ;;  %v209_v6 = vld [vmem:[%s783_s1 + $0x8] sm:$0xff]  ;;  %v211_v8 = vld [vmem:[%s783_s1 + $0x18] sm:$0xff]  ;;  %s301_s6 = sshll.u32 %s207_s5, 4  ;;  %s303_s7 = sshll.u32 %s300_s4, 4  ;;  %s302_s6 = int_to_ptr.vmem [resolvable:$true] %s301_s6  ;;  %s304_s7 = int_to_ptr.hbm [resolvable:$true] %s303_s7 }
  0x25   : > { %411 = vmatpush.msra.mxu2 %v215_v1  ;;  %412 = vmatpush.msra.mxu3 %v215_v1  ;;  %v218_v9 = vld [vmem:[%s784_s2 + $0x10] sm:$0xff]  ;;  %v216_v10 = vld [vmem:[%s784_s2] sm:$0xff]  ;;  %v219_v11 = vld [vmem:[%s784_s2 + $0x18] sm:$0xff]  ;;  %s288_s15 = scalar_lea.sflag [#allocation4], %s704_s19  ;;  %s535_s21 = sshra.s32 %s304_s7, 4  ;;  %s536_s21 = int_to_ptr.hbm [resolvable:$true] %s535_s21 }
  0x26   : > { %266 = vmatpush.msra.mxu0 %v214_v2  ;;  %413 = vmatpush.msra.mxu1 %v214_v2  ;;  %v217_v12 = vld [vmem:[%s784_s2 + $0x8] sm:$0xff]  ;;  %s537_s8 = scalar_lea.hbm %s536_s21, 32  ;;  %s541_s11 = scalar_lea.hbm %s785_s3, 64 }
  0x27   : > { %414 = vmatpush.msra.mxu2 %v214_v2  ;;  %415 = vmatpush.msra.mxu3 %v214_v2  ;;  %p538_p4 = scmp.ne.s32.totalorder %s536_s21, %s537_s8  ;;  %p542_p7 = scmp.lt.s32.totalorder %s536_s21, %s785_s3 }
  0x28   : > { %267 = vmatpush.msra.mxu0 %v213_v3  ;;  %416 = vmatpush.msra.mxu1 %v213_v3  ;;  %p543_p8 = scmp.lt.s32.totalorder %s541_s11, %s537_s8 }
  0x29   : > { %417 = vmatpush.msra.mxu2 %v213_v3  ;;  %418 = vmatpush.msra.mxu3 %v213_v3  ;;  %p539_p5 = pnand %p538_p4, %p681_p9 }
  0x2a   : > { %268 = vmatpush.msra.mxu0 %v212_v4  ;;  %419 = vmatpush.msra.mxu1 %v212_v4  ;;  %p544_p10 = por %p543_p8, %p542_p7 }
  0x2b   : > { %420 = vmatpush.msra.mxu2 %v212_v4  ;;  %421 = vmatpush.msra.mxu3 %v212_v4  ;;  %p540_p6 = pneg %p539_p5 }
  0x2c   : > { %399 = vmatmul.msk.f32.vlgmr.msra.gmra.mxu0 %vm240_vm0, %v208_v5  ;;  %400 = vmatmul.msk.f32.vlgmr.msra.gmra.mxu1 %vm240_vm0, %v209_v6 }
  0x2d   : > { %401 = vmatmul.msk.f32.vlgmr.msra.gmra.mxu2 %vm240_vm0, %v210_v7  ;;  %402 = vmatmul.msk.f32.vlgmr.msra.gmra.mxu3 %vm240_vm0, %v211_v8  ;;  %p545_p13 = pnand %p544_p10, %p540_p6 }
  0x2e   : > { %232 = vperm.xlu1 %490, %v218_v9   ;;  %222 = vperm.xlu0 %489, %v216_v10  }
  0x36   : > { %237 = vperm.xlu1 %490, %v219_v11   ;;  %227 = vperm.xlu0 %489, %v217_v12  }
  0xa0   : > { %v223_v13 = vpop.permute.xlu0 %222  ;;  %v233_v14 = vpop.permute.xlu1 %232 }
  0xa8   : > { %v228_v15 = vpop.permute.xlu0 %227  ;;  %v238_v20 = vpop.permute.xlu1 %237 }
  0xa9   : > { %v270_v16 = vpop.f32.mrf.mxu0  ;;  %v273_v17 = vpop.f32.mrf.mxu1 }
  0xaa   : > { %v271_v18 = vadd.f32 %v270_v16, %v223_v13  ;;  %v274_v19 = vadd.f32 %v273_v17, %v228_v15 }
  0xac   : > { %283 = vst.msk [vmem:[%s207_s5] sm:$0xff] %vm282_vm1, %v271_v18 }
  0xad   : > { %284 = vst.msk [vmem:[%s207_s5 + $0x8] sm:$0xff] %vm282_vm1, %v274_v19 }
  0xb0   : > { %v276_v21 = vpop.f32.mrf.mxu2  ;;  %v279_v22 = vpop.f32.mrf.mxu3 }
  0xb1   : > { %v277_v23 = vadd.f32 %v276_v21, %v233_v14  ;;  %v280_v24 = vadd.f32 %v279_v22, %v238_v20 }
  0xb3   : > { %285 = vst.msk [vmem:[%s207_s5 + $0x10] sm:$0xff] %vm282_vm1, %v277_v23 }
  0xb4   : > { %286 = vst.msk [vmem:[%s207_s5 + $0x18] sm:$0xff] %vm282_vm1, %v280_v24 }
  0xb5   : > { %548 = shalt.err (!%p545_p13)
}
  0xb6   : > { %s608_s19 = smov 128   ;;  %s609_s22 = smov 8  }
  0xb7   : > { %424 = dma.vmem_to_hbm [thread:$0]  (%p681_p9), %s302_s6, 512, %s304_s7, %s288_s15, %s608_s19, %s608_s19, %s609_s22  }
  0xb8 PF: > { %s318_s24 = sand.u32 1, %s583_s12   ;;  %p431_p0 = pnand %p392_p12, %p688_p11 }
  0xb9   : > { %s319_s28 = scalar_lea.sflag [#allocation4], %s318_s24 }
  0xba   : > { %p432_p1 = pneg %p431_p0 }
  0xbc   : > { %578 = dma.done.wait (%p432_p1), %s319_s28, 512  }
  0xbd   : > { %580 = vsyncadd (%p432_p1), %s319_s28, 4294966784  ;;  %s19_s17 = sadd.s32 1, %s603_s17   ;;  %s790_s12 = smov %s587_s13 }
  0xbe   : > { %p16_p2 = scmp.ge.s32.totalorder %s19_s17, 4   ;;  %s791_s13 = smov %s591_s14 }
  0xbf   : > { %s792_s14 = smov %s686_s26  ;;  %s793_s15 = smov %s599_s16 }
  0xc0   : > { %s794_s16 = smov %s796_s20  ;;  %18 = sbr.rel (!%p16_p2) target bundleno = 6 (0x6), region = 77 }
  0xc5   :  { %325 = vsyncpa [#allocation3], 1 }
  0xc6   :  { %327 = vsyncpa [#allocation3 + $0x1], 1 }
  0xc7   :  { %328 = vsyncpa [#allocation4], 1 }
  0xc8   :  { %330 = vsyncpa [#allocation4 + $0x1], 1 }

</bundles_post_ra>
